<compile_context>
chip_gen: v6e
topology: v6e:2x2x1
jax: 0.10.0
libtpu: 0.0.40
codegen_flags: <defaults>
</compile_context>

<pallas_src>
import functools

import jax
import jax.numpy as jnp
import numpy as np
from jax.experimental import pallas as pl
from jax.experimental.pallas import tpu as pltpu


# ----------------------------------------------------------------------------
# Kernels
# ----------------------------------------------------------------------------
def _pool_fc_softmax_fullhw_kernel(x_ref, w_ref, b_ref, o_ref, *, inv_hw):
    """One batch-block at a time, full spatial extent in the block.

    x_ref : (tn, C, HW)   contiguous block of whole samples
    w_ref : (C, D)        fc weight (in x out layout)
    b_ref : (1, D)        fc bias
    o_ref : (tn, D)       softmax probabilities
    """
    pooled = jnp.sum(x_ref[...].astype(jnp.float32), axis=-1) * inv_hw      # (tn, C)
    logits = jnp.dot(pooled, w_ref[...].astype(jnp.float32),
                     preferred_element_type=jnp.float32)
    logits = logits + b_ref[...].astype(jnp.float32)
    m = jnp.max(logits, axis=-1, keepdims=True)
    e = jnp.exp(logits - m)
    o_ref[...] = (e / jnp.sum(e, axis=-1, keepdims=True)).astype(o_ref.dtype)


def _pool_fc_softmax_chunked_kernel(x_ref, w_ref, b_ref, o_ref, acc_ref, *,
                                    inv_hw, nhw, tail_len):
    """Spatial-chunked reduction (only used when one sample's C*HW is too big).

    Grid: (batch blocks ["parallel"], HW chunks ["arbitrary"]).
    x_ref : (tn, C, thw) chunk of the spatial axis (lane-dense last dim)
    acc_ref: VMEM (tn, C) running spatial sum (persists across HW chunks)
    """
    j = pl.program_id(1)

    @pl.when(j == 0)
    def _init():
        acc_ref[...] = jnp.zeros_like(acc_ref)

    def _accum(masked):
        x = x_ref[...].astype(jnp.float32)
        if masked:
            # Zero out-of-range lanes of the tail chunk (OOB block padding).
            lane = jax.lax.broadcasted_iota(jnp.int32, x.shape, x.ndim - 1)
            x = jnp.where(lane < tail_len, x, 0.0)
        acc_ref[...] += jnp.sum(x, axis=-1)

    if tail_len is None:                      # HW divides evenly: never mask
        _accum(False)
    else:                                     # only the last chunk pays the mask
        @pl.when(j < nhw - 1)
        def _full():
            _accum(False)

        @pl.when(j == nhw - 1)
        def _tail():
            _accum(True)

    @pl.when(j == nhw - 1)
    def _finalize():
        pooled = acc_ref[...] * inv_hw                                       # (tn, C)
        logits = jnp.dot(pooled, w_ref[...].astype(jnp.float32),
                         preferred_element_type=jnp.float32)
        logits = logits + b_ref[...].astype(jnp.float32)
        m = jnp.max(logits, axis=-1, keepdims=True)
        e = jnp.exp(logits - m)
        o_ref[...] = (e / jnp.sum(e, axis=-1, keepdims=True)).astype(o_ref.dtype)


# ----------------------------------------------------------------------------
# Generation-aware planning
# ----------------------------------------------------------------------------
@functools.lru_cache(maxsize=1)
def _vmem_budget():
    """(target bytes per x block, vmem_limit_bytes), generation-aware."""
    cap = 64 << 20                      # conservative default (v7x per-TC VMEM)
    try:
        cap = int(pltpu.get_tpu_info().vmem_capacity_bytes)
    except Exception:
        pass
    if cap <= (64 << 20):
        # v7x-class: 64 MiB physical -> ~10 MiB blocks, 44 MiB scoped limit
        # (2x double-buffered x blocks + w/b/out/acc stay well inside).
        return 10 << 20, 44 << 20
    # v5e / v6e: 128 MiB physical -> ~16 MiB blocks, 64 MiB scoped limit.
    return 16 << 20, 64 << 20


def _plan(N, C, HW, itemsize, target_block):
    """Pick (mode, batch tile tn, spatial tile thw)."""
    per_sample = C * HW * itemsize
    if per_sample * min(N, 8) <= target_block:
        # Common case: full-HW contiguous blocks, batch-blocked.
        tn = target_block // per_sample
        if tn >= N or N <= 8:
            tn = N
        else:
            tn = (tn // 8) * 8          # keep the (tn, D) output block sublane-aligned
        return "fullhw", tn, HW
    # Huge feature maps: chunk the spatial axis in 128-lane multiples.
    tn = N if N <= 8 else 8
    per_lane = tn * C * itemsize
    thw = max(128, (target_block // per_lane) // 128 * 128)
    if thw >= HW:
        thw = HW
    return "chunked", tn, thw


# ----------------------------------------------------------------------------
# Wrapper
# ----------------------------------------------------------------------------
@functools.partial(jax.jit, static_argnames=("force_hw_chunk",))
def jig_cls_forward(x_nchw, wf, bf, *, force_hw_chunk=None):
    """jig_cls forward: AdaptiveAvgPool2d((1,1)) -> flatten -> fc -> softmax."""
    N, C, H, W = x_nchw.shape
    HW = H * W
    Cw, D = wf.shape
    assert C == Cw
    itemsize = jnp.dtype(x_nchw.dtype).itemsize

    # Contiguous NCHW -> (N, C, HW): metadata-only reshape; puts the pooled
    # axis lane-dense.
    x = x_nchw.reshape(N, C, HW)
    b2 = bf.reshape(1, D)

    target_block, vmem_limit = _vmem_budget()
    if force_hw_chunk is not None:
        mode, tn, thw = "chunked", N, int(force_hw_chunk)
    else:
        mode, tn, thw = _plan(N, C, HW, itemsize, target_block)

    inv_hw = 1.0 / HW
    nb = pl.cdiv(N, tn)

    if mode == "fullhw":
        kernel = functools.partial(_pool_fc_softmax_fullhw_kernel, inv_hw=inv_hw)
        grid = (nb,)
        in_specs = [
            pl.BlockSpec((tn, C, HW), lambda i: (i, 0, 0)),
            pl.BlockSpec((C, D), lambda i: (0, 0)),
            pl.BlockSpec((1, D), lambda i: (0, 0)),
        ]
        out_specs = pl.BlockSpec((tn, D), lambda i: (i, 0))
        scratch_shapes = []
        dims = ("parallel",)
    else:
        nhw = pl.cdiv(HW, thw)
        rem = HW - (nhw - 1) * thw
        tail_len = None if rem == thw else rem
        kernel = functools.partial(_pool_fc_softmax_chunked_kernel,
                                   inv_hw=inv_hw, nhw=nhw, tail_len=tail_len)
        grid = (nb, nhw)
        in_specs = [
            pl.BlockSpec((tn, C, thw), lambda i, j: (i, 0, j)),
            pl.BlockSpec((C, D), lambda i, j: (0, 0)),
            pl.BlockSpec((1, D), lambda i, j: (0, 0)),
        ]
        out_specs = pl.BlockSpec((tn, D), lambda i, j: (i, 0))
        scratch_shapes = [pltpu.VMEM((tn, C), jnp.float32)]
        dims = ("parallel", "arbitrary")

    cost = pl.CostEstimate(
        flops=int(N * C * HW + 2 * N * C * D + 4 * N * D),
        transcendentals=int(N * D),
        bytes_accessed=int(N * C * HW * itemsize + C * D * 4 + D * 4 + N * D * 4),
    )

    return pl.pallas_call(
        kernel,
        out_shape=jax.ShapeDtypeStruct((N, D), jnp.float32),
        grid_spec=pltpu.PrefetchScalarGridSpec(
            num_scalar_prefetch=0,
            grid=grid,
            in_specs=in_specs,
            out_specs=out_specs,
            scratch_shapes=scratch_shapes,
        ),
        compiler_params=pltpu.CompilerParams(
            dimension_semantics=dims,
            vmem_limit_bytes=vmem_limit,
        ),
        cost_estimate=cost,
    )(x, wf, b2)


# ----------------------------------------------------------------------------
# Pure-JAX reference (same math, no Pallas)
# ----------------------------------------------------------------------------
def jig_cls_reference(x_nchw, wf, bf):
    pooled = jnp.mean(x_nchw, axis=(2, 3))            # AdaptiveAvgPool2d((1,1))
    logits = pooled @ wf + bf                         # nn.Linear
    return jax.nn.softmax(logits, axis=1)             # nn.Softmax(dim=1)


if __name__ == "__main__":
    # Small shapes consistent with the module defaults
    # (in_channel=256, jig_classes=31).
    batch, in_channel, H, W = 2, 256, 16, 16
    jig_classes = 31

    key = jax.random.PRNGKey(0)
    k_x, k_w, k_b, k_x2 = jax.random.split(key, 4)

    x = jax.random.normal(k_x, (batch, in_channel, H, W), jnp.float32)
    # fc weight stored as (in, out) == W.T of the PyTorch (out, in) layout.
    wf = 0.05 * jax.random.normal(k_w, (in_channel, jig_classes), jnp.float32)
    bf = 0.05 * jax.random.normal(k_b, (jig_classes,), jnp.float32)

    # 1) Auto plan: full-HW, batch-blocked, single "parallel" grid axis.
    ref = jax.block_until_ready(jig_cls_reference(x, wf, bf))
    out = jax.block_until_ready(jig_cls_forward(x, wf, bf))
    assert out.shape == (batch, jig_classes)
    np.testing.assert_allclose(np.asarray(out), np.asarray(ref),
                               rtol=1e-4, atol=1e-5)

    # 2) Forced spatial-chunked reduction path (what huge feature maps use),
    #    with a non-128-multiple HW (15*15 = 225) so the masked tail chunk
    #    and the pl.when init/accumulate/finalize path are exercised.
    x2 = jax.random.normal(k_x2, (batch, in_channel, 15, 15), jnp.float32)
    ref2 = jax.block_until_ready(jig_cls_reference(x2, wf, bf))
    out2 = jax.block_until_ready(jig_cls_forward(x2, wf, bf, force_hw_chunk=128))
    np.testing.assert_allclose(np.asarray(out2), np.asarray(ref2),
                               rtol=1e-4, atol=1e-5)

    # Softmax rows sum to 1.
    np.testing.assert_allclose(np.asarray(out).sum(axis=1),
                               np.ones(batch), rtol=1e-5, atol=1e-5)

    print("KERNEL_OK")
</pallas_src>

<mosaic_0001>
module attributes {stable_mosaic.version = 11 : i64} {
  func.func @_pool_fc_softmax_fullhw_kernel(%arg0: i32, %arg1: memref<2x256x256xf32, #tpu.memory_space<vmem>>, %arg2: memref<256x31xf32, #tpu.memory_space<vmem>>, %arg3: memref<1x31xf32, #tpu.memory_space<vmem>>, %arg4: memref<2x31xf32, #tpu.memory_space<vmem>>) attributes {dimension_semantics = [#tpu.dimension_semantics<parallel>], iteration_bounds = array<i64: 1>, scalar_prefetch = 0 : i64, scratch_operands = 0 : i64, tpu.core_type = #tpu.core_type<tc>, window_params = [{transform_indices = @transform_0, window_bounds = array<i64: 2, 256, 256>}, {pipeline_mode = #tpu.pipeline_mode<synchronous>, transform_indices = @transform_1, window_bounds = array<i64: 256, 31>}, {pipeline_mode = #tpu.pipeline_mode<synchronous>, transform_indices = @transform_2, window_bounds = array<i64: 1, 31>}, {transform_indices = @transform_3, window_bounds = array<i64: 2, 31>}]} {
    %c0 = arith.constant 0 : index
    %c0_0 = arith.constant 0 : index
    %c0_1 = arith.constant 0 : index
    %0 = vector.load %arg1[%c0, %c0_0, %c0_1] : memref<2x256x256xf32, #tpu.memory_space<vmem>>, vector<2x256x256xf32>
    %cst = arith.constant dense<0.000000e+00> : vector<2x256xf32>
    %1 = vector.multi_reduction <add>, %0, %cst [2] : vector<2x256x256xf32> to vector<2x256xf32>
    %cst_2 = arith.constant 3.906250e-03 : f32
    %2 = vector.broadcast %cst_2 : f32 to vector<2x256xf32>
    %3 = arith.mulf %1, %2 : vector<2x256xf32>
    %c0_3 = arith.constant 0 : index
    %c0_4 = arith.constant 0 : index
    %4 = vector.load %arg2[%c0_3, %c0_4] : memref<256x31xf32, #tpu.memory_space<vmem>>, vector<256x31xf32>
    %cst_5 = arith.constant dense<0.000000e+00> : vector<2x31xf32>
    %5 = tpu.matmul %3, %4, %cst_5 {dimension_numbers = #tpu.dot_dimension_numbers<[1], [0], [0], [1], [0, 0, 1, 1], [], []>} : vector<2x256xf32>, vector<256x31xf32>, vector<2x31xf32> -> vector<2x31xf32>
    %c0_6 = arith.constant 0 : index
    %c0_7 = arith.constant 0 : index
    %6 = vector.load %arg3[%c0_6, %c0_7] : memref<1x31xf32, #tpu.memory_space<vmem>>, vector<1x31xf32>
    %7 = vector.broadcast %6 : vector<1x31xf32> to vector<2x31xf32>
    %8 = arith.addf %5, %7 : vector<2x31xf32>
    %cst_8 = arith.constant dense<0xFF800000> : vector<2xf32>
    %9 = vector.multi_reduction <maximumf>, %8, %cst_8 [1] : vector<2x31xf32> to vector<2xf32>
    %10 = vector.shape_cast %9 : vector<2xf32> to vector<2x1xf32>
    %11 = vector.broadcast %10 : vector<2x1xf32> to vector<2x31xf32>
    %12 = arith.subf %8, %11 : vector<2x31xf32>
    %13 = math.exp %12 : vector<2x31xf32>
    %cst_9 = arith.constant dense<0.000000e+00> : vector<2xf32>
    %14 = vector.multi_reduction <add>, %13, %cst_9 [1] : vector<2x31xf32> to vector<2xf32>
    %15 = vector.shape_cast %14 : vector<2xf32> to vector<2x1xf32>
    %16 = vector.broadcast %15 : vector<2x1xf32> to vector<2x31xf32>
    %17 = arith.divf %13, %16 : vector<2x31xf32>
    %c0_10 = arith.constant 0 : index
    %c0_11 = arith.constant 0 : index
    %18 = vector.load %arg4[%c0_10, %c0_11] : memref<2x31xf32, #tpu.memory_space<vmem>>, vector<2x31xf32>
    tpu.vector_store %arg4[%c0_10, %c0_11], %17 {strides = array<i32>} : memref<2x31xf32, #tpu.memory_space<vmem>>, vector<2x31xf32>,
    return
  }
  func.func @transform_0(%arg0: i32) -> (i32, i32, i32) {
    %c0_i32 = arith.constant 0 : i32
    %c0_i32_0 = arith.constant 0 : i32
    %c0_i32_1 = arith.constant 0 : i32
    return %arg0, %c0_i32, %c0_i32_0 : i32, i32, i32
  }
  func.func @transform_1(%arg0: i32) -> (i32, i32) {
    %c0_i32 = arith.constant 0 : i32
    %c0_i32_0 = arith.constant 0 : i32
    %c0_i32_1 = arith.constant 0 : i32
    return %c0_i32, %c0_i32_0 : i32, i32
  }
  func.func @transform_2(%arg0: i32) -> (i32, i32) {
    %c0_i32 = arith.constant 0 : i32
    %c0_i32_0 = arith.constant 0 : i32
    %c0_i32_1 = arith.constant 0 : i32
    return %c0_i32, %c0_i32_0 : i32, i32
  }
  func.func @transform_3(%arg0: i32) -> (i32, i32) {
    %c0_i32 = arith.constant 0 : i32
    %c0_i32_0 = arith.constant 0 : i32
    return %arg0, %c0_i32 : i32, i32
  }
}

</mosaic_0001>

<bundles_post_ra>
// kernel: jig_cls_forward.1
= control target key start
LH: loop header
LB: loop body
LE: loop exit
PB: predicated region body
PF: predicated region fallthrough
CT: control target
= control target key end

     0   :  { %s1734_s0 = inlined_call_operand.vmem [shape: f32[2,256,256], index: 0, kind: input, shape index: {}]   ;;  %s1735_s1 = inlined_call_operand.vmem [shape: f32[256,31], index: 1, kind: input, shape index: {}]   ;;  %s1736_s2 = inlined_call_operand.vmem [shape: f32[1,31], index: 2, kind: input, shape index: {}]   ;;  %s1737_s3 = inlined_call_operand.hbm [shape: f32[2,31], index: 3, kind: output, shape index: {}]  }
   0x1   :  { %v111_v0 = vld [vmem:[%s1734_s0 + $0x300] sm:$0xff]  ;;  %v112_v1 = vld [vmem:[%s1734_s0 + $0x308] sm:$0xff]  ;;  %v113_v5 = vld [vmem:[%s1734_s0 + $0x310] sm:$0xff] }
   0x2   :  { %v47_v2 = vld [vmem:[%s1734_s0 + $0x100] sm:$0xff]  ;;  %v287_v3 = vadd.f32 %v112_v1, %v111_v0  ;;  %v48_v4 = vld [vmem:[%s1734_s0 + $0x108] sm:$0xff]  ;;  %v114_v6 = vld [vmem:[%s1734_s0 + $0x318] sm:$0xff] }
   0x3   :  { %v191_v7 = vadd.f32 %v48_v4, %v47_v2  ;;  %v49_v8 = vld [vmem:[%s1734_s0 + $0x110] sm:$0xff]  ;;  %v50_v9 = vld [vmem:[%s1734_s0 + $0x118] sm:$0xff]  ;;  %v290_v10 = vadd.f32 %v114_v6, %v113_v5  ;;  %v15_v14 = vld [vmem:[%s1734_s0] sm:$0xff] }
   0x4   :  { %288 = vadd.xlane.f32.xlu1 %v287_v3  ;;  %v194_v11 = vadd.f32 %v50_v9, %v49_v8  ;;  %v17_v12 = vld [vmem:[%s1734_s0 + $0x10] sm:$0xff]  ;;  %v18_v13 = vld [vmem:[%s1734_s0 + $0x18] sm:$0xff]  ;;  %v16_v15 = vld [vmem:[%s1734_s0 + $0x8] sm:$0xff] }
   0x5   :  { %192 = vadd.xlane.f32.xlu0 %v191_v7  ;;  %v146_v16 = vadd.f32 %v18_v13, %v17_v12  ;;  %v143_v17 = vadd.f32 %v16_v15, %v15_v14  ;;  %v79_v18 = vld [vmem:[%s1734_s0 + $0x200] sm:$0xff]  ;;  %v80_v19 = vld [vmem:[%s1734_s0 + $0x208] sm:$0xff]  ;;  %v81_v26 = vld [vmem:[%s1734_s0 + $0x210] sm:$0xff] }
   0x6   :  { %v51_v20 = vld [vmem:[%s1734_s0 + $0x120] sm:$0xff]  ;;  %v52_v21 = vld [vmem:[%s1734_s0 + $0x128] sm:$0xff]  ;;  %v239_v22 = vadd.f32 %v80_v19, %v79_v18  ;;  %v82_v27 = vld [vmem:[%s1734_s0 + $0x218] sm:$0xff] }
   0x7   :  { %v197_v23 = vadd.f32 %v52_v21, %v51_v20  ;;  %v115_v24 = vld [vmem:[%s1734_s0 + $0x320] sm:$0xff]  ;;  %v116_v25 = vld [vmem:[%s1734_s0 + $0x328] sm:$0xff]  ;;  %v242_v29 = vadd.f32 %v82_v27, %v81_v26  ;;  %v53_v30 = vld [vmem:[%s1734_s0 + $0x130] sm:$0xff] }
   0x8   :  { %291 = vadd.xlane.f32.xlu1 %v290_v10  ;;  %v293_v28 = vadd.f32 %v116_v25, %v115_v24  ;;  %v54_v31 = vld [vmem:[%s1734_s0 + $0x138] sm:$0xff]  ;;  %v19_v32 = vld [vmem:[%s1734_s0 + $0x20] sm:$0xff]  ;;  %v20_v33 = vld [vmem:[%s1734_s0 + $0x28] sm:$0xff] }
   0x9   :  { %195 = vadd.xlane.f32.xlu0 %v194_v11  ;;  %v200_v34 = vadd.f32 %v54_v31, %v53_v30  ;;  %v149_v35 = vadd.f32 %v20_v33, %v19_v32  ;;  %v117_v36 = vld [vmem:[%s1734_s0 + $0x330] sm:$0xff]  ;;  %v118_v37 = vld [vmem:[%s1734_s0 + $0x338] sm:$0xff]  ;;  %v83_v38 = vld [vmem:[%s1734_s0 + $0x220] sm:$0xff] }
   0xa   :  { %v84_v39 = vld [vmem:[%s1734_s0 + $0x228] sm:$0xff]  ;;  %v296_v40 = vadd.f32 %v118_v37, %v117_v36  ;;  %v55_v42 = vld [vmem:[%s1734_s0 + $0x140] sm:$0xff]  ;;  %v21_v44 = vld [vmem:[%s1734_s0 + $0x30] sm:$0xff] }
   0xb   :  { %v245_v41 = vadd.f32 %v84_v39, %v83_v38  ;;  %v56_v43 = vld [vmem:[%s1734_s0 + $0x148] sm:$0xff]  ;;  %v22_v45 = vld [vmem:[%s1734_s0 + $0x38] sm:$0xff]  ;;  %v119_v48 = vld [vmem:[%s1734_s0 + $0x340] sm:$0xff] }
   0xc   :  { %147 = vadd.xlane.f32.xlu1 %v146_v16  ;;  %v203_v46 = vadd.f32 %v56_v43, %v55_v42  ;;  %v152_v47 = vadd.f32 %v22_v45, %v21_v44  ;;  %v120_v49 = vld [vmem:[%s1734_s0 + $0x348] sm:$0xff]  ;;  %v85_v50 = vld [vmem:[%s1734_s0 + $0x230] sm:$0xff]  ;;  %v86_v51 = vld [vmem:[%s1734_s0 + $0x238] sm:$0xff] }
   0xd   :  { %144 = vadd.xlane.f32.xlu0 %v143_v17  ;;  %v299_v52 = vadd.f32 %v120_v49, %v119_v48  ;;  %v248_v53 = vadd.f32 %v86_v51, %v85_v50  ;;  %v57_v54 = vld [vmem:[%s1734_s0 + $0x150] sm:$0xff]  ;;  %v58_v55 = vld [vmem:[%s1734_s0 + $0x158] sm:$0xff]  ;;  %v23_v56 = vld [vmem:[%s1734_s0 + $0x40] sm:$0xff] }
   0xe   :  { %v24_v57 = vld [vmem:[%s1734_s0 + $0x48] sm:$0xff]  ;;  %v206_v58 = vadd.f32 %v58_v55, %v57_v54  ;;  %v121_v60 = vld [vmem:[%s1734_s0 + $0x350] sm:$0xff]  ;;  %v122_v61 = vld [vmem:[%s1734_s0 + $0x358] sm:$0xff] }
   0xf   :  { %v155_v59 = vadd.f32 %v24_v57, %v23_v56  ;;  %v87_v62 = vld [vmem:[%s1734_s0 + $0x240] sm:$0xff]  ;;  %v88_v63 = vld [vmem:[%s1734_s0 + $0x248] sm:$0xff]  ;;  %v302_v0 = vadd.f32 %v122_v61, %v121_v60  ;;  %v25_v4 = vld [vmem:[%s1734_s0 + $0x50] sm:$0xff] }
  0x10   :  { %240 = vadd.xlane.f32.xlu1 %v239_v22  ;;  %v251_v1 = vadd.f32 %v88_v63, %v87_v62  ;;  %v59_v2 = vld [vmem:[%s1734_s0 + $0x160] sm:$0xff]  ;;  %v60_v3 = vld [vmem:[%s1734_s0 + $0x168] sm:$0xff]  ;;  %v26_v5 = vld [vmem:[%s1734_s0 + $0x58] sm:$0xff] }
  0x11   :  { %198 = vadd.xlane.f32.xlu0 %v197_v23 }
  0x14   :  { %294 = vadd.xlane.f32.xlu1 %v293_v28 }
  0x15   :  { %243 = vadd.xlane.f32.xlu0 %v242_v29 }
  0x18   :  { %201 = vadd.xlane.f32.xlu1 %v200_v34 }
  0x19   :  { %150 = vadd.xlane.f32.xlu0 %v149_v35 }
  0x1c   :  { %297 = vadd.xlane.f32.xlu1 %v296_v40 }
  0x1d   :  { %246 = vadd.xlane.f32.xlu0 %v245_v41 }
  0x20   :  { %204 = vadd.xlane.f32.xlu1 %v203_v46 }
  0x21   :  { %153 = vadd.xlane.f32.xlu0 %v152_v47 }
  0x24   :  { %300 = vadd.xlane.f32.xlu1 %v299_v52 }
  0x25   :  { %249 = vadd.xlane.f32.xlu0 %v248_v53 }
  0x28   :  { %207 = vadd.xlane.f32.xlu1 %v206_v58 }
  0x29   :  { %156 = vadd.xlane.f32.xlu0 %v155_v59 }
  0x2a   :  { %8 = vsyncpa [#allocation3], 0  ;;  %v209_v6 = vadd.f32 %v60_v3, %v59_v2  ;;  %v158_v7 = vadd.f32 %v26_v5, %v25_v4  ;;  %v123_v8 = vld [vmem:[%s1734_s0 + $0x360] sm:$0xff]  ;;  %v124_v9 = vld [vmem:[%s1734_s0 + $0x368] sm:$0xff]  ;;  %vm513_vm0 = vcmask 130112   ;;  %vm520_vm1 = vcmask 195712  }
  0x2b   :  { %v89_v10 = vld [vmem:[%s1734_s0 + $0x250] sm:$0xff]  ;;  %v90_v11 = vld [vmem:[%s1734_s0 + $0x258] sm:$0xff]  ;;  %v305_v12 = vadd.f32 %v124_v9, %v123_v8  ;;  %v27_v16 = vld [vmem:[%s1734_s0 + $0x60] sm:$0xff]  ;;  %vm527_vm2 = vcmask 261312   ;;  %vm534_vm3 = vcmask 326912   ;;  %vm541_vm4 = vcmask 392512  }
  0x2c   :  { %303 = vadd.xlane.f32.xlu1 %v302_v0  ;;  %v254_v13 = vadd.f32 %v90_v11, %v89_v10  ;;  %v61_v14 = vld [vmem:[%s1734_s0 + $0x170] sm:$0xff]  ;;  %v62_v15 = vld [vmem:[%s1734_s0 + $0x178] sm:$0xff]  ;;  %v28_v17 = vld [vmem:[%s1734_s0 + $0x68] sm:$0xff]  ;;  %vm548_vm5 = vcmask 458112   ;;  %vm555_vm6 = vcmask 523712   ;;  %vm562_vm7 = vcmask 589312  }
  0x2d   :  { %252 = vadd.xlane.f32.xlu0 %v251_v1  ;;  %v212_v18 = vadd.f32 %v62_v15, %v61_v14  ;;  %v161_v19 = vadd.f32 %v28_v17, %v27_v16  ;;  %v125_v20 = vld [vmem:[%s1734_s0 + $0x370] sm:$0xff]  ;;  %v126_v21 = vld [vmem:[%s1734_s0 + $0x378] sm:$0xff]  ;;  %v91_v22 = vld [vmem:[%s1734_s0 + $0x260] sm:$0xff]  ;;  %vm569_vm8 = vcmask 654912   ;;  %vm576_vm9 = vcmask 720512   ;;  %s1015_s7 = smov [#allocation2]  }
  0x2e   :  { %v92_v23 = vld [vmem:[%s1734_s0 + $0x268] sm:$0xff]  ;;  %v308_v24 = vadd.f32 %v126_v21, %v125_v20  ;;  %v63_v26 = vld [vmem:[%s1734_s0 + $0x180] sm:$0xff]  ;;  %v29_v28 = vld [vmem:[%s1734_s0 + $0x70] sm:$0xff]  ;;  %vm583_vm10 = vcmask 786112   ;;  %vm590_vm11 = vcmask 851712   ;;  %vm597_vm12 = vcmask 917312  }
  0x2f   :  { %v257_v25 = vadd.f32 %v92_v23, %v91_v22  ;;  %v64_v27 = vld [vmem:[%s1734_s0 + $0x188] sm:$0xff]  ;;  %v30_v29 = vld [vmem:[%s1734_s0 + $0x78] sm:$0xff]  ;;  %v127_v32 = vld [vmem:[%s1734_s0 + $0x380] sm:$0xff]  ;;  %vm604_vm13 = vcmask 982912   ;;  %vm611_vm14 = vcmask 1048512   ;;  %vm850_vm15 = vcmask 1041409  }
  0x30   :  { %210 = vadd.xlane.f32.xlu1 %v209_v6  ;;  %v215_v30 = vadd.f32 %v64_v27, %v63_v26  ;;  %v164_v31 = vadd.f32 %v30_v29, %v29_v28  ;;  %v128_v33 = vld [vmem:[%s1734_s0 + $0x388] sm:$0xff]  ;;  %v93_v34 = vld [vmem:[%s1734_s0 + $0x270] sm:$0xff]  ;;  %v94_v35 = vld [vmem:[%s1734_s0 + $0x278] sm:$0xff]  ;;  %s944_s8 = sshll.u32 %s1015_s7, 4  ;;  %s945_s8 = int_to_ptr.vmem [resolvable:$true] %s944_s8 }
  0x31   :  { %159 = vadd.xlane.f32.xlu0 %v158_v7  ;;  %v311_v36 = vadd.f32 %v128_v33, %v127_v32  ;;  %v260_v37 = vadd.f32 %v94_v35, %v93_v34  ;;  %v65_v38 = vld [vmem:[%s1734_s0 + $0x190] sm:$0xff]  ;;  %v66_v39 = vld [vmem:[%s1734_s0 + $0x198] sm:$0xff]  ;;  %v31_v40 = vld [vmem:[%s1734_s0 + $0x80] sm:$0xff]  ;;  %p998_p1 = scmp.lt.s32.totalorder %s945_s8, %s945_s8 }
  0x32   :  { %v32_v41 = vld [vmem:[%s1734_s0 + $0x88] sm:$0xff]  ;;  %v218_v42 = vadd.f32 %v66_v39, %v65_v38  ;;  %v129_v44 = vld [vmem:[%s1734_s0 + $0x390] sm:$0xff]  ;;  %v130_v45 = vld [vmem:[%s1734_s0 + $0x398] sm:$0xff] }
  0x33   :  { %v167_v43 = vadd.f32 %v32_v41, %v31_v40  ;;  %v95_v46 = vld [vmem:[%s1734_s0 + $0x280] sm:$0xff]  ;;  %v96_v47 = vld [vmem:[%s1734_s0 + $0x288] sm:$0xff]  ;;  %v314_v48 = vadd.f32 %v130_v45, %v129_v44  ;;  %v33_v52 = vld [vmem:[%s1734_s0 + $0x90] sm:$0xff] }
  0x34   :  { %306 = vadd.xlane.f32.xlu1 %v305_v12  ;;  %v263_v49 = vadd.f32 %v96_v47, %v95_v46  ;;  %v67_v50 = vld [vmem:[%s1734_s0 + $0x1a0] sm:$0xff]  ;;  %v68_v51 = vld [vmem:[%s1734_s0 + $0x1a8] sm:$0xff]  ;;  %v34_v53 = vld [vmem:[%s1734_s0 + $0x98] sm:$0xff] }
  0x35   :  { %255 = vadd.xlane.f32.xlu0 %v254_v13  ;;  %v221_v54 = vadd.f32 %v68_v51, %v67_v50  ;;  %v170_v55 = vadd.f32 %v34_v53, %v33_v52  ;;  %v131_v56 = vld [vmem:[%s1734_s0 + $0x3a0] sm:$0xff]  ;;  %v132_v57 = vld [vmem:[%s1734_s0 + $0x3a8] sm:$0xff]  ;;  %v97_v58 = vld [vmem:[%s1734_s0 + $0x290] sm:$0xff] }
  0x36   :  { %v98_v59 = vld [vmem:[%s1734_s0 + $0x298] sm:$0xff]  ;;  %v317_v60 = vadd.f32 %v132_v57, %v131_v56  ;;  %v69_v62 = vld [vmem:[%s1734_s0 + $0x1b0] sm:$0xff]  ;;  %v35_v0 = vld [vmem:[%s1734_s0 + $0xa0] sm:$0xff] }
  0x37   :  { %v266_v61 = vadd.f32 %v98_v59, %v97_v58  ;;  %v70_v63 = vld [vmem:[%s1734_s0 + $0x1b8] sm:$0xff]  ;;  %v36_v1 = vld [vmem:[%s1734_s0 + $0xa8] sm:$0xff]  ;;  %v133_v4 = vld [vmem:[%s1734_s0 + $0x3b0] sm:$0xff] }
  0x38   :  { %213 = vadd.xlane.f32.xlu1 %v212_v18  ;;  %v224_v2 = vadd.f32 %v70_v63, %v69_v62  ;;  %v173_v3 = vadd.f32 %v36_v1, %v35_v0  ;;  %v134_v5 = vld [vmem:[%s1734_s0 + $0x3b8] sm:$0xff]  ;;  %v99_v6 = vld [vmem:[%s1734_s0 + $0x2a0] sm:$0xff]  ;;  %v100_v7 = vld [vmem:[%s1734_s0 + $0x2a8] sm:$0xff] }
  0x39   :  { %162 = vadd.xlane.f32.xlu0 %v161_v19  ;;  %v320_v8 = vadd.f32 %v134_v5, %v133_v4  ;;  %v269_v9 = vadd.f32 %v100_v7, %v99_v6  ;;  %v71_v10 = vld [vmem:[%s1734_s0 + $0x1c0] sm:$0xff]  ;;  %v72_v11 = vld [vmem:[%s1734_s0 + $0x1c8] sm:$0xff]  ;;  %v37_v12 = vld [vmem:[%s1734_s0 + $0xb0] sm:$0xff] }
  0x3a   :  { %v38_v13 = vld [vmem:[%s1734_s0 + $0xb8] sm:$0xff]  ;;  %v227_v14 = vadd.f32 %v72_v11, %v71_v10  ;;  %v135_v16 = vld [vmem:[%s1734_s0 + $0x3c0] sm:$0xff]  ;;  %v136_v17 = vld [vmem:[%s1734_s0 + $0x3c8] sm:$0xff] }
  0x3b   :  { %v176_v15 = vadd.f32 %v38_v13, %v37_v12  ;;  %v101_v18 = vld [vmem:[%s1734_s0 + $0x2b0] sm:$0xff]  ;;  %v102_v19 = vld [vmem:[%s1734_s0 + $0x2b8] sm:$0xff]  ;;  %v323_v20 = vadd.f32 %v136_v17, %v135_v16  ;;  %v75_v34 = vld [vmem:[%s1734_s0 + $0x1e0] sm:$0xff] }
  0x3c   :  { %309 = vadd.xlane.f32.xlu1 %v308_v24  ;;  %v272_v21 = vadd.f32 %v102_v19, %v101_v18  ;;  %v73_v22 = vld [vmem:[%s1734_s0 + $0x1d0] sm:$0xff]  ;;  %v74_v23 = vld [vmem:[%s1734_s0 + $0x1d8] sm:$0xff]  ;;  %v39_v24 = vld [vmem:[%s1734_s0 + $0xc0] sm:$0xff] }
  0x3d   :  { %258 = vadd.xlane.f32.xlu0 %v257_v25  ;;  %v40_v25 = vld [vmem:[%s1734_s0 + $0xc8] sm:$0xff]  ;;  %v230_v26 = vadd.f32 %v74_v23, %v73_v22  ;;  %v137_v28 = vld [vmem:[%s1734_s0 + $0x3d0] sm:$0xff]  ;;  %v138_v29 = vld [vmem:[%s1734_s0 + $0x3d8] sm:$0xff]  ;;  %v502_v22 = vlaneseq }
  0x3e   :  { %v179_v27 = vadd.f32 %v40_v25, %v39_v24  ;;  %v326_v32 = vadd.f32 %v138_v29, %v137_v28  ;;  %v76_v35 = vld [vmem:[%s1734_s0 + $0x1e8] sm:$0xff]  ;;  %v139_v40 = vld [vmem:[%s1734_s0 + $0x3e0] sm:$0xff]  ;;  %v430_v45 = vld [vmem:[%s1735_s1 + $0xf8] sm:$0xff] }
  0x3f   :  { %v233_v38 = vadd.f32 %v76_v35, %v75_v34  ;;  %v140_v41 = vld [vmem:[%s1734_s0 + $0x3e8] sm:$0xff]  ;;  %v77_v47 = vld [vmem:[%s1734_s0 + $0x1f0] sm:$0xff]  ;;  %953 = vmatprep.subr.mxu0 %v430_v45  ;;  %v43_v50 = vld [vmem:[%s1734_s0 + $0xe0] sm:$0xff] }
  0x40   :  { %216 = vadd.xlane.f32.xlu1 %v215_v30  ;;  %v103_v30 = vld [vmem:[%s1734_s0 + $0x2c0] sm:$0xff]  ;;  %v329_v44 = vadd.f32 %v140_v41, %v139_v40  ;;  %v44_v51 = vld [vmem:[%s1734_s0 + $0xe8] sm:$0xff]  ;;  %v429_v52 = vld [vmem:[%s1735_s1 + $0xf0] sm:$0xff] }
  0x41   :  { %165 = vadd.xlane.f32.xlu0 %v164_v31  ;;  %v104_v31 = vld [vmem:[%s1734_s0 + $0x2c8] sm:$0xff]  ;;  %v413_v53 = vld [vmem:[%s1735_s1 + $0x70] sm:$0xff]  ;;  %v185_v56 = vadd.f32 %v44_v51, %v43_v50  ;;  %v142_v58 = vld [vmem:[%s1734_s0 + $0x3f8] sm:$0xff] }
  0x42   :  { %v275_v33 = vadd.f32 %v104_v31, %v103_v30  ;;  %v141_v57 = vld [vmem:[%s1734_s0 + $0x3f0] sm:$0xff]  ;;  %v412_v59 = vld [vmem:[%s1735_s1 + $0x68] sm:$0xff]  ;;  %v427_v62 = vld [vmem:[%s1735_s1 + $0xe0] sm:$0xff]  ;;  %v1506_v30 = vshrl.u32 %v502_v22, 7 }
  0x43   :  { %v411_v63 = vld [vmem:[%s1735_s1 + $0x60] sm:$0xff]  ;;  %v332_v0 = vadd.f32 %v142_v58, %v141_v57  ;;  %v426_v1 = vld [vmem:[%s1735_s1 + $0xd8] sm:$0xff]  ;;  %v45_v6 = vld [vmem:[%s1734_s0 + $0xf0] sm:$0xff] }
  0x44   :  { %312 = vadd.xlane.f32.xlu1 %v311_v36  ;;  %v41_v36 = vld [vmem:[%s1734_s0 + $0xd0] sm:$0xff]  ;;  %v110_v4 = vld [vmem:[%s1734_s0 + $0x2f8] sm:$0xff]  ;;  %v424_v11 = vld [vmem:[%s1735_s1 + $0xc8] sm:$0xff] }
  0x45   :  { %261 = vadd.xlane.f32.xlu0 %v260_v37  ;;  %v42_v37 = vld [vmem:[%s1734_s0 + $0xd8] sm:$0xff]  ;;  %v408_v13 = vld [vmem:[%s1735_s1 + $0x48] sm:$0xff]  ;;  %v421_v18 = vld [vmem:[%s1735_s1 + $0xb0] sm:$0xff] }
  0x46   :  { %v182_v39 = vadd.f32 %v42_v37, %v41_v36  ;;  %v410_v5 = vld [vmem:[%s1735_s1 + $0x58] sm:$0xff]  ;;  %v405_v19 = vld [vmem:[%s1735_s1 + $0x30] sm:$0xff]  ;;  %v419_v23 = vld [vmem:[%s1735_s1 + $0xa0] sm:$0xff] }
  0x47   :  { %v46_v7 = vld [vmem:[%s1734_s0 + $0xf8] sm:$0xff]  ;;  %v403_v24 = vld [vmem:[%s1735_s1 + $0x20] sm:$0xff]  ;;  %v417_v28 = vld [vmem:[%s1735_s1 + $0x90] sm:$0xff] }
  0x48   :  { %219 = vadd.xlane.f32.xlu1 %v218_v42  ;;  %v105_v42 = vld [vmem:[%s1734_s0 + $0x2d0] sm:$0xff]  ;;  %v188_v12 = vadd.f32 %v46_v7, %v45_v6  ;;  %v422_v16 = vld [vmem:[%s1735_s1 + $0xb8] sm:$0xff]  ;;  %v400_v34 = vld [vmem:[%s1735_s1 + $0x8] sm:$0xff] }
  0x49   :  { %168 = vadd.xlane.f32.xlu0 %v167_v43  ;;  %v106_v43 = vld [vmem:[%s1734_s0 + $0x2d8] sm:$0xff]  ;;  %v401_v29 = vld [vmem:[%s1735_s1 + $0x10] sm:$0xff]  ;;  %v415_v35 = vld [vmem:[%s1735_s1 + $0x80] sm:$0xff] }
  0x4a   :  { %v278_v46 = vadd.f32 %v106_v43, %v105_v42  ;;  %v406_v17 = vld [vmem:[%s1735_s1 + $0x38] sm:$0xff]  ;;  %v399_v36 = vld [vmem:[%s1735_s1] sm:$0xff] }
  0x4b   :  { %v418_v25 = vld [vmem:[%s1735_s1 + $0x98] sm:$0xff] }
  0x4c   :  { %315 = vadd.xlane.f32.xlu1 %v314_v48  ;;  %v78_v48 = vld [vmem:[%s1734_s0 + $0x1f8] sm:$0xff] }
  0x4d   :  { %264 = vadd.xlane.f32.xlu0 %v263_v49  ;;  %v414_v49 = vld [vmem:[%s1735_s1 + $0x78] sm:$0xff] }
  0x4e   :  { %954 = vmatpush3.msra.mxu0 %v414_v49 }
  0x4f   :  { %955 = vmatprep.subr.mxu0 %v429_v52 }
  0x50   :  { %222 = vadd.xlane.f32.xlu1 %v221_v54  ;;  %v236_v54 = vadd.f32 %v78_v48, %v77_v47  ;;  %956 = vmatpush3.msra.mxu0 %v413_v53 }
  0x51   :  { %171 = vadd.xlane.f32.xlu0 %v170_v55  ;;  %v428_v55 = vld [vmem:[%s1735_s1 + $0xe8] sm:$0xff] }
  0x52   :  { %957 = vmatprep.subr.mxu0 %v428_v55 }
  0x53   :  { %958 = vmatpush3.msra.mxu0 %v412_v59 }
  0x54   :  { %318 = vadd.xlane.f32.xlu1 %v317_v60  ;;  %v107_v60 = vld [vmem:[%s1734_s0 + $0x2e0] sm:$0xff]  ;;  %959 = vmatprep.subr.mxu0 %v427_v62 }
  0x55   :  { %267 = vadd.xlane.f32.xlu0 %v266_v61  ;;  %v108_v61 = vld [vmem:[%s1734_s0 + $0x2e8] sm:$0xff]  ;;  %960 = vmatpush3.msra.mxu0 %v411_v63 }
  0x56   :  { %961 = vmatprep.subr.mxu0 %v426_v1 }
  0x57   :  { %962 = vmatpush3.msra.mxu0 %v410_v5 }
  0x58   :  { %225 = vadd.xlane.f32.xlu1 %v224_v2  ;;  %v281_v2 = vadd.f32 %v108_v61, %v107_v60 }
  0x59   :  { %174 = vadd.xlane.f32.xlu0 %v173_v3  ;;  %v109_v3 = vld [vmem:[%s1734_s0 + $0x2f0] sm:$0xff] }
  0x5a   :  { %v284_v10 = vadd.f32 %v110_v4, %v109_v3 }
  0x5c   :  { %321 = vadd.xlane.f32.xlu1 %v320_v8  ;;  %v425_v8 = vld [vmem:[%s1735_s1 + $0xd0] sm:$0xff] }
  0x5d   :  { %270 = vadd.xlane.f32.xlu0 %v269_v9  ;;  %963 = vmatprep.subr.mxu0 %v425_v8  ;;  %v409_v9 = vld [vmem:[%s1735_s1 + $0x50] sm:$0xff] }
  0x5e   :  { %964 = vmatpush3.msra.mxu0 %v409_v9 }
  0x5f   :  { %965 = vmatprep.subr.mxu0 %v424_v11 }
  0x60   :  { %228 = vadd.xlane.f32.xlu1 %v227_v14  ;;  %966 = vmatpush3.msra.mxu0 %v408_v13  ;;  %v423_v14 = vld [vmem:[%s1735_s1 + $0xc0] sm:$0xff] }
  0x61   :  { %177 = vadd.xlane.f32.xlu0 %v176_v15  ;;  %967 = vmatprep.subr.mxu0 %v423_v14  ;;  %v407_v15 = vld [vmem:[%s1735_s1 + $0x40] sm:$0xff] }
  0x62   :  { %968 = vmatpush3.msra.mxu0 %v407_v15 }
  0x63   :  { %969 = vmatprep.subr.mxu0 %v422_v16 }
  0x64   :  { %324 = vadd.xlane.f32.xlu1 %v323_v20  ;;  %970 = vmatpush3.msra.mxu0 %v406_v17  ;;  %v420_v20 = vld [vmem:[%s1735_s1 + $0xa8] sm:$0xff] }
  0x65   :  { %273 = vadd.xlane.f32.xlu0 %v272_v21  ;;  %971 = vmatprep.subr.mxu0 %v421_v18  ;;  %v404_v21 = vld [vmem:[%s1735_s1 + $0x28] sm:$0xff] }
  0x66   :  { %972 = vmatpush3.msra.mxu0 %v405_v19 }
  0x67   :  { %973 = vmatprep.subr.mxu0 %v420_v20 }
  0x68   :  { %231 = vadd.xlane.f32.xlu1 %v230_v26  ;;  %974 = vmatpush3.msra.mxu0 %v404_v21  ;;  %v402_v26 = vld [vmem:[%s1735_s1 + $0x18] sm:$0xff] }
  0x69   :  { %180 = vadd.xlane.f32.xlu0 %v179_v27  ;;  %975 = vmatprep.subr.mxu0 %v419_v23  ;;  %v1498_v27 = vand.u32 127, %v502_v22 }
  0x6a   :  { %976 = vmatpush3.msra.mxu0 %v403_v24 }
  0x6b   :  { %977 = vmatprep.subr.mxu0 %v418_v25  ;;  %v508_v31 = vadd.s32 4294967288, %v1498_v27  ;;  %v515_v51 = vadd.s32 4294967280, %v1498_v27  ;;  %v529_v19 = vadd.s32 4294967264, %v1498_v27 }
  0x6c   :  { %327 = vadd.xlane.f32.xlu1 %v326_v32  ;;  %978 = vmatpush3.msra.mxu0 %v402_v26  ;;  %v416_v32 = vld [vmem:[%s1735_s1 + $0x88] sm:$0xff] }
  0x6d   :  { %276 = vadd.xlane.f32.xlu0 %v275_v33  ;;  %979 = vmatprep.subr.mxu0 %v417_v28  ;;  %v511_v40 = vsub.s32 %v508_v31, %v1506_v30  ;;  %v518_v60 = vsub.s32 %v515_v51, %v1506_v30 }
  0x6e   :  { %980 = vmatpush3.msra.mxu0 %v401_v29  ;;  %v532_v29 = vsub.s32 %v529_v19, %v1506_v30 }
  0x6f   :  { %981 = vmatprep.subr.mxu0 %v416_v32 }
  0x70   :  { %234 = vadd.xlane.f32.xlu1 %v233_v38  ;;  %982 = vmatpush3.msra.mxu0 %v400_v34  ;;  %v506_v38 = vsub.s32 %v1498_v27, %v1506_v30 }
  0x71   :  { %183 = vadd.xlane.f32.xlu0 %v182_v39  ;;  %983 = vmatprep.subr.mxu0 %v415_v35 }
  0x72   :  { %984 = vmatpush3.msra.mxu0 %v399_v36 }
  0x74   :  { %330 = vadd.xlane.f32.xlu1 %v329_v44 }
  0x75   :  { %279 = vadd.xlane.f32.xlu0 %v278_v46 }
  0x78   :  { %237 = vadd.xlane.f32.xlu1 %v236_v54 }
  0x79   :  { %186 = vadd.xlane.f32.xlu0 %v185_v56 }
  0x7c   :  { %333 = vadd.xlane.f32.xlu1 %v332_v0  ;;  %v522_v0 = vadd.s32 4294967272, %v1498_v27 }
  0x7d   :  { %282 = vadd.xlane.f32.xlu0 %v281_v2 }
  0x7e   :  { %v525_v9 = vsub.s32 %v522_v0, %v1506_v30 }
  0x80   :  { %285 = vadd.xlane.f32.xlu1 %v284_v10 }
  0x81   :  { %189 = vadd.xlane.f32.xlu0 %v188_v12 }
  0x8d   :  { %v289_v33 = vpop.xlane.xlu1 %288 }
  0x8e   :  { %v193_v37 = vpop.xlane.xlu0 %192  ;;  %v383_v39 = vmul.f32 0.00390625, %v289_v33 }
  0x8f   :  { %v351_v41 = vmul.f32 0.00390625, %v193_v37 }
  0x90   :  { %v774_v46 = vrot.slane %v383_v39, %v506_v38  ;;  %v536_v39 = vadd.s32 4294967256, %v1498_v27 }
  0x91   :  { %v292_v42 = vpop.xlane.xlu1 %291  ;;  %v616_v48 = vrot.slane %v351_v41, %v506_v38 }
  0x92   :  { %v384_v43 = vmul.f32 0.00390625, %v292_v42  ;;  %v196_v44 = vpop.xlane.xlu0 %195 }
  0x93   :  { %v352_v45 = vmul.f32 0.00390625, %v196_v44 }
  0x94   :  { %v778_v47 = vrot.slane %v384_v43, %v511_v40 }
  0x95   :  { %v620_v49 = vrot.slane %v352_v45, %v511_v40  ;;  %v148_v50 = vpop.xlane.xlu1 %147 }
  0x96   :  { %v779_v52 = vsel %vm513_vm0, %v778_v47, %v774_v46  ;;  %v336_v53 = vmul.f32 0.00390625, %v148_v50  ;;  %v145_v54 = vpop.xlane.xlu0 %144 }
  0x97   :  { %v621_v55 = vsel %vm513_vm0, %v620_v49, %v616_v48  ;;  %v335_v56 = vmul.f32 0.00390625, %v145_v54  ;;  %v539_v48 = vsub.s32 %v536_v39, %v1506_v30 }
  0x98   :  { %v512_v57 = vrot.slane %v336_v53, %v511_v40 }
  0x99   :  { %v507_v58 = vrot.slane %v335_v56, %v506_v38  ;;  %v241_v59 = vpop.xlane.xlu1 %240 }
  0x9a   :  { %v199_v61 = vpop.xlane.xlu0 %198  ;;  %v367_v1 = vmul.f32 0.00390625, %v241_v59 }
  0x9b   :  { %v514_v62 = vsel %vm513_vm0, %v512_v57, %v507_v58  ;;  %v353_v63 = vmul.f32 0.00390625, %v199_v61  ;;  %v543_v57 = vadd.s32 4294967248, %v1498_v27 }
  0x9c   :  { %v695_v10 = vrot.slane %v367_v1, %v506_v38 }
  0x9d   :  { %v625_v2 = vrot.slane %v353_v63, %v518_v60  ;;  %v295_v3 = vpop.xlane.xlu1 %294 }
  0x9e   :  { %v385_v4 = vmul.f32 0.00390625, %v295_v3  ;;  %v244_v5 = vpop.xlane.xlu0 %243 }
  0x9f   :  { %v626_v6 = vsel %vm520_vm1, %v625_v2, %v621_v55  ;;  %v368_v7 = vmul.f32 0.00390625, %v244_v5  ;;  %v1550_v2 = vsub.s32 %v543_v57, %v1506_v30 }
  0xa0   :  { %v783_v8 = vrot.slane %v385_v4, %v518_v60 }
  0xa1   :  { %v699_v11 = vrot.slane %v368_v7, %v511_v40  ;;  %v202_v12 = vpop.xlane.xlu1 %201 }
  0xa2   :  { %v784_v13 = vsel %vm520_vm1, %v783_v8, %v779_v52  ;;  %v354_v14 = vmul.f32 0.00390625, %v202_v12  ;;  %v151_v15 = vpop.xlane.xlu0 %150 }
  0xa3   :  { %v700_v16 = vsel %vm513_vm0, %v699_v11, %v695_v10  ;;  %v337_v17 = vmul.f32 0.00390625, %v151_v15  ;;  %vm925_vm0 = vcmask 246784  }
  0xa4   :  { %v630_v18 = vrot.slane %v354_v14, %v525_v9 }
  0xa5   :  { %v519_v20 = vrot.slane %v337_v17, %v518_v60  ;;  %v298_v21 = vpop.xlane.xlu1 %297 }
  0xa6   :  { %v631_v22 = vsel %vm527_vm2, %v630_v18, %v626_v6  ;;  %v386_v23 = vmul.f32 0.00390625, %v298_v21  ;;  %v247_v24 = vpop.xlane.xlu0 %246 }
  0xa7   :  { %v521_v25 = vsel %vm520_vm1, %v519_v20, %v514_v62  ;;  %v369_v26 = vmul.f32 0.00390625, %v247_v24 }
  0xa8   :  { %v788_v28 = vrot.slane %v386_v23, %v525_v9 }
  0xa9   :  { %v704_v31 = vrot.slane %v369_v26, %v518_v60  ;;  %v205_v32 = vpop.xlane.xlu1 %204 }
  0xaa   :  { %v789_v33 = vsel %vm527_vm2, %v788_v28, %v784_v13  ;;  %v355_v34 = vmul.f32 0.00390625, %v205_v32  ;;  %v154_v35 = vpop.xlane.xlu0 %153 }
  0xab   :  { %v705_v36 = vsel %vm520_vm1, %v704_v31, %v700_v16  ;;  %v338_v37 = vmul.f32 0.00390625, %v154_v35 }
  0xac   :  { %v635_v38 = vrot.slane %v355_v34, %v532_v29 }
  0xad   :  { %v526_v40 = vrot.slane %v338_v37, %v525_v9  ;;  %v301_v41 = vpop.xlane.xlu1 %300 }
  0xae   :  { %v636_v42 = vsel %vm534_vm3, %v635_v38, %v631_v22  ;;  %v387_v43 = vmul.f32 0.00390625, %v301_v41  ;;  %v250_v44 = vpop.xlane.xlu0 %249  ;;  %v550_v41 = vadd.s32 4294967240, %v1498_v27 }
  0xaf   :  { %v528_v45 = vsel %vm527_vm2, %v526_v40, %v521_v25  ;;  %v370_v46 = vmul.f32 0.00390625, %v250_v44  ;;  %v557_v44 = vadd.s32 4294967232, %v1498_v27 }
  0xb0   :  { %v793_v47 = vrot.slane %v387_v43, %v532_v29 }
  0xb1   :  { %v709_v49 = vrot.slane %v370_v46, %v525_v9  ;;  %v208_v50 = vpop.xlane.xlu1 %207  ;;  %v564_v46 = vadd.s32 4294967224, %v1498_v27 }
  0xb2   :  { %v794_v51 = vsel %vm534_vm3, %v793_v47, %v789_v33  ;;  %v356_v52 = vmul.f32 0.00390625, %v208_v50  ;;  %v157_v53 = vpop.xlane.xlu0 %156  ;;  %v571_v47 = vadd.s32 4294967216, %v1498_v27  ;;  %v578_v50 = vadd.s32 4294967208, %v1498_v27 }
  0xb3   :  { %v710_v54 = vsel %vm527_vm2, %v709_v49, %v705_v36  ;;  %v339_v55 = vmul.f32 0.00390625, %v157_v53 }
  0xb4   :  { %v640_v56 = vrot.slane %v356_v52, %v539_v48 }
  0xb5   :  { %v533_v58 = vrot.slane %v339_v55, %v532_v29  ;;  %v304_v59 = vpop.xlane.xlu1 %303 }
  0xb6   :  { %v641_v60 = vsel %vm541_vm4, %v640_v56, %v636_v42  ;;  %v388_v61 = vmul.f32 0.00390625, %v304_v59  ;;  %v253_v62 = vpop.xlane.xlu0 %252  ;;  %v592_v56 = vadd.s32 4294967192, %v1498_v27  ;;  %v599_v59 = vadd.s32 4294967184, %v1498_v27 }
  0xb7   :  { %v535_v63 = vsel %vm534_vm3, %v533_v58, %v528_v45  ;;  %v371_v0 = vmul.f32 0.00390625, %v253_v62  ;;  %v1599_v58 = vsub.s32 %v557_v44, %v1506_v30  ;;  %v1605_v62 = vsub.s32 %v564_v46, %v1506_v30 }
  0xb8   :  { %v798_v1 = vrot.slane %v388_v61, %v539_v48 }
  0xb9   :  { %v714_v3 = vrot.slane %v371_v0, %v532_v29  ;;  %v211_v4 = vpop.xlane.xlu1 %210 }
  0xba   :  { %v1553_v5 = vsel %vm541_vm4, %v798_v1, %v794_v51  ;;  %v357_v6 = vmul.f32 0.00390625, %v211_v4  ;;  %v160_v7 = vpop.xlane.xlu0 %159  ;;  %v585_v51 = vadd.s32 4294967200, %v1498_v27 }
  0xbb   :  { %v715_v8 = vsel %vm534_vm3, %v714_v3, %v710_v54  ;;  %v340_v9 = vmul.f32 0.00390625, %v160_v7  ;;  %v1612_v3 = vsub.s32 %v578_v50, %v1506_v30 }
  0xbc   :  { %v645_v10 = vrot.slane %v357_v6, %v1550_v2  ;;  %v1615_v4 = vsub.s32 %v585_v51, %v1506_v30 }
  0xbd   :  { %v540_v11 = vrot.slane %v340_v9, %v539_v48  ;;  %v307_v12 = vpop.xlane.xlu1 %306  ;;  %v1622_v9 = vsub.s32 %v592_v56, %v1506_v30 }
  0xbe   :  { %v1558_v13 = vsel %vm548_vm5, %v645_v10, %v641_v60  ;;  %v256_v14 = vpop.xlane.xlu0 %255  ;;  %v389_v45 = vmul.f32 0.00390625, %v307_v12  ;;  %v606_v60 = vadd.s32 4294967176, %v1498_v27 }
  0xbf   :  { %v1561_v15 = vsel %vm541_vm4, %v540_v11, %v535_v63  ;;  %v372_v16 = vmul.f32 0.00390625, %v256_v14  ;;  %v1608_v63 = vsub.s32 %v571_v47, %v1506_v30  ;;  %v1628_v14 = vsub.s32 %v599_v59, %v1506_v30 }
  0xc0   :  { %v803_v61 = vrot.slane %v389_v45, %v1550_v2 }
  0xc1   :  { %v719_v17 = vrot.slane %v372_v16, %v539_v48  ;;  %v214_v18 = vpop.xlane.xlu1 %213  ;;  %v1589_v48 = vsub.s32 %v550_v41, %v1506_v30  ;;  %v1631_v16 = vsub.s32 %v606_v60, %v1506_v30 }
  0xc2   :  { %v163_v19 = vpop.xlane.xlu0 %162  ;;  %v358_v49 = vmul.f32 0.00390625, %v214_v18 }
  0xc3   :  { %v1564_v20 = vsel %vm541_vm4, %v719_v17, %v715_v8  ;;  %v341_v53 = vmul.f32 0.00390625, %v163_v19  ;;  %v804_v17 = vsel %vm548_vm5, %v803_v61, %v1553_v5 }
  0xc4   :  { %v650_v0 = vrot.slane %v358_v49, %v1589_v48 }
  0xc5   :  { %v310_v21 = vpop.xlane.xlu1 %309  ;;  %v547_v6 = vrot.slane %v341_v53, %v1550_v2 }
  0xc6   :  { %v259_v22 = vpop.xlane.xlu0 %258  ;;  %v390_v54 = vmul.f32 0.00390625, %v310_v21 }
  0xc7   :  { %v373_v57 = vmul.f32 0.00390625, %v259_v22  ;;  %v651_v22 = vsel %vm555_vm6, %v650_v0, %v1558_v13  ;;  %v549_v41 = vsel %vm548_vm5, %v547_v6, %v1561_v15 }
  0xc8   :  { %v808_v7 = vrot.slane %v390_v54, %v1589_v48 }
  0xc9   :  { %v217_v23 = vpop.xlane.xlu1 %216  ;;  %v724_v11 = vrot.slane %v373_v57, %v1550_v2 }
  0xca   :  { %v166_v24 = vpop.xlane.xlu0 %165  ;;  %v359_v1 = vmul.f32 0.00390625, %v217_v23  ;;  %v809_v30 = vsel %vm555_vm6, %v808_v7, %v804_v17 }
  0xcb   :  { %v342_v8 = vmul.f32 0.00390625, %v166_v24 }
  0xcc   :  { %v655_v23 = vrot.slane %v359_v1, %v1599_v58 }
  0xcd   :  { %v313_v25 = vpop.xlane.xlu1 %312  ;;  %v554_v44 = vrot.slane %v342_v8, %v1589_v48 }
  0xce   :  { %v262_v26 = vpop.xlane.xlu0 %261  ;;  %v391_v12 = vmul.f32 0.00390625, %v313_v25 }
  0xcf   :  { %v374_v18 = vmul.f32 0.00390625, %v262_v26  ;;  %v725_v26 = vsel %vm548_vm5, %v724_v11, %v1564_v20 }
  0xd0   :  { %v813_v13 = vrot.slane %v391_v12, %v1599_v58 }
  0xd1   :  { %v220_v28 = vpop.xlane.xlu1 %219 }
  0xd2   :  { %v169_v29 = vpop.xlane.xlu0 %168  ;;  %v360_v19 = vmul.f32 0.00390625, %v220_v28 }
  0xd3   :  { %v343_v21 = vmul.f32 0.00390625, %v169_v29 }
  0xd4   :  { %v660_v15 = vrot.slane %v360_v19, %v1605_v62 }
  0xd5   :  { %v316_v31 = vpop.xlane.xlu1 %315 }
  0xd6   :  { %v265_v32 = vpop.xlane.xlu0 %264  ;;  %v392_v2 = vmul.f32 0.00390625, %v316_v31  ;;  %v729_v31 = vrot.slane %v374_v18, %v1589_v48 }
  0xd7   :  { %v375_v24 = vmul.f32 0.00390625, %v265_v32  ;;  %v561_v32 = vrot.slane %v343_v21, %v1599_v58 }
  0xd8   :  { %v818_v47 = vrot.slane %v392_v2, %v1605_v62 }
  0xd9   :  { %v223_v33 = vpop.xlane.xlu1 %222  ;;  %v734_v20 = vrot.slane %v375_v24, %v1599_v58 }
  0xda   :  { %v1566_v34 = vpop.xlane.xlu0 %171  ;;  %v361_v45 = vmul.f32 0.00390625, %v223_v33  ;;  %v656_v33 = vsel %vm562_vm7, %v655_v23, %v651_v22 }
  0xdb   :  { %v344_v28 = vmul.f32 0.00390625, %v1566_v34  ;;  %v556_v34 = vsel %vm555_vm6, %v554_v44, %v549_v41  ;;  %v661_v58 = vsel %vm569_vm8, %v660_v15, %v656_v33 }
  0xdc   :  { %v563_v59 = vsel %vm562_vm7, %v561_v32, %v556_v34 }
  0xdd   :  { %v1568_v35 = vpop.xlane.xlu1 %318  ;;  %v568_v54 = vrot.slane %v344_v28, %v1605_v62 }
  0xde   :  { %v1570_v36 = vpop.xlane.xlu0 %267  ;;  %v393_v29 = vmul.f32 0.00390625, %v1568_v35  ;;  %v665_v35 = vrot.slane %v361_v45, %v1608_v63 }
  0xdf   :  { %v376_v46 = vmul.f32 0.00390625, %v1570_v36  ;;  %v814_v36 = vsel %vm562_vm7, %v813_v13, %v809_v30 }
  0xe0   :  { %v823_v56 = vrot.slane %v393_v29, %v1608_v63 }
  0xe1   :  { %v1572_v37 = vpop.xlane.xlu1 %225 }
  0xe2   :  { %v1574_v38 = vpop.xlane.xlu0 %174  ;;  %v362_v49 = vmul.f32 0.00390625, %v1572_v37  ;;  %v730_v37 = vsel %vm555_vm6, %v729_v31, %v725_v26 }
  0xe3   :  { %v345_v48 = vmul.f32 0.00390625, %v1574_v38  ;;  %v739_v38 = vrot.slane %v376_v46, %v1605_v62  ;;  %v735_v60 = vsel %vm562_vm7, %v734_v20, %v730_v37  ;;  %v570_v62 = vsel %vm569_vm8, %v568_v54, %v563_v59 }
  0xe4   :  { %v670_v61 = vrot.slane %v362_v49, %v1612_v3 }
  0xe5   :  { %v1576_v39 = vpop.xlane.xlu1 %321  ;;  %v575_v6 = vrot.slane %v345_v48, %v1608_v63  ;;  %v740_v18 = vsel %vm569_vm8, %v739_v38, %v735_v60 }
  0xe6   :  { %v1578_v40 = vpop.xlane.xlu0 %270  ;;  %v394_v51 = vmul.f32 0.00390625, %v1576_v39  ;;  %v819_v39 = vsel %vm569_vm8, %v818_v47, %v814_v36 }
  0xe7   :  { %v377_v57 = vmul.f32 0.00390625, %v1578_v40  ;;  %v666_v40 = vsel %vm576_vm9, %v665_v35, %v661_v58  ;;  %v824_v12 = vsel %vm576_vm9, %v823_v56, %v819_v39 }
  0xe8   :  { %v828_v7 = vrot.slane %v394_v51, %v1612_v3 }
  0xe9   :  { %v1581_v42 = vpop.xlane.xlu1 %228  ;;  %v744_v17 = vrot.slane %v377_v57, %v1608_v63  ;;  %v577_v63 = vsel %vm576_vm9, %v575_v6, %v570_v62 }
  0xea   :  { %v1583_v43 = vpop.xlane.xlu0 %177  ;;  %v363_v0 = vmul.f32 0.00390625, %v1581_v42 }
  0xeb   :  { %v346_v19 = vmul.f32 0.00390625, %v1583_v43  ;;  %v745_v43 = vsel %vm576_vm9, %v744_v17, %v740_v18 }
  0xec   :  { %v675_v23 = vrot.slane %v363_v0, %v1615_v4 }
  0xed   :  { %v1593_v52 = vpop.xlane.xlu1 %324  ;;  %v582_v13 = vrot.slane %v346_v19, %v1612_v3 }
  0xee   :  { %v1595_v55 = vpop.xlane.xlu0 %273  ;;  %v395_v8 = vmul.f32 0.00390625, %v1593_v52  ;;  %v671_v52 = vsel %vm583_vm10, %v670_v61, %v666_v40 }
  0xef   :  { %v378_v42 = vmul.f32 0.00390625, %v1595_v55  ;;  %v829_v55 = vsel %vm583_vm10, %v828_v7, %v824_v12  ;;  %v676_v15 = vsel %vm590_vm11, %v675_v23, %v671_v52  ;;  %v584_v0 = vsel %vm583_vm10, %v582_v13, %v577_v63 }
  0xf0   :  { %v833_v30 = vrot.slane %v395_v8, %v1615_v4 }
  0xf1   :  { %v1617_v27 = vpop.xlane.xlu1 %231 }
  0xf2   :  { %v1624_v10 = vpop.xlane.xlu0 %180  ;;  %v364_v21 = vmul.f32 0.00390625, %v1617_v27  ;;  %v749_v27 = vrot.slane %v378_v42, %v1612_v3  ;;  %v834_v20 = vsel %vm590_vm11, %v833_v30, %v829_v55 }
  0xf4   :  { %v680_v28 = vrot.slane %v364_v21, %v1622_v9 }
  0xf5   :  { %v328_v25 = vpop.xlane.xlu1 %327 }
  0xf6   :  { %v277_v5 = vpop.xlane.xlu0 %276  ;;  %v396_v22 = vmul.f32 0.00390625, %v328_v25  ;;  %v347_v25 = vmul.f32 0.00390625, %v1624_v10  ;;  %v681_v36 = vsel %vm597_vm12, %v680_v28, %v676_v15 }
  0xf7   :  { %v379_v26 = vmul.f32 0.00390625, %v277_v5 }
  0xf8   :  { %v838_v29 = vrot.slane %v396_v22, %v1622_v9  ;;  %v589_v34 = vrot.slane %v347_v25, %v1615_v4  ;;  %v952_v22 = vld [vmem:[%s1736_s2] ss:$0 sm:$0xff]  ;;  %s993_s2 = scalar_lea.vmem %s945_s8, 32 }
  0xf9   :  { %v235_v50 = vpop.xlane.xlu1 %234  ;;  %v754_v35 = vrot.slane %v379_v26, %v1615_v4  ;;  %p994_p0 = scmp.ne.s32.totalorder %s945_s8, %s993_s2  ;;  %p999_p2 = scmp.lt.s32.totalorder %s993_s2, %s993_s2 }
  0xfa   :  { %v184_v53 = vpop.xlane.xlu0 %183  ;;  %v365_v2 = vmul.f32 0.00390625, %v235_v50  ;;  %v750_v50 = vsel %vm583_vm10, %v749_v27, %v745_v43  ;;  %v839_v54 = vsel %vm597_vm12, %v838_v29, %v834_v20  ;;  %v591_v6 = vsel %vm590_vm11, %v589_v34, %v584_v0 }
  0xfb   :  { %v348_v46 = vmul.f32 0.00390625, %v184_v53  ;;  %p1000_p3 = por %p999_p2, %p998_p1 }
  0xfc   :  { %v685_v32 = vrot.slane %v365_v2, %v1628_v14 }
  0xfd   :  { %v331_v1 = vpop.xlane.xlu1 %330  ;;  %v596_v56 = vrot.slane %v348_v46, %v1622_v9  ;;  %p1001_p4 = pnand %p1000_p3, %p994_p0 }
  0xfe   :  { %v280_v11 = vpop.xlane.xlu0 %279  ;;  %v397_v24 = vmul.f32 0.00390625, %v331_v1  ;;  %v686_v58 = vsel %vm604_vm13, %v685_v32, %v681_v36  ;;  %v755_v1 = vsel %vm590_vm11, %v754_v35, %v750_v50 }
  0xff   :  { %v380_v31 = vmul.f32 0.00390625, %v280_v11 }
 0x100   :  { %v843_v33 = vrot.slane %v397_v24, %v1628_v14 }
 0x101   :  { %v238_v41 = vpop.xlane.xlu1 %237  ;;  %v759_v51 = vrot.slane %v380_v31, %v1622_v9 }
 0x102   :  { %v366_v44 = vmul.f32 0.00390625, %v238_v41  ;;  %v187_v45 = vpop.xlane.xlu0 %186  ;;  %v844_v59 = vsel %vm604_vm13, %v843_v33, %v839_v54 }
 0x103   :  { %v349_v5 = vmul.f32 0.00390625, %v187_v45  ;;  %v760_v7 = vsel %vm597_vm12, %v759_v51, %v755_v1 }
 0x104   :  { %v690_v10 = vrot.slane %v366_v44, %v1631_v16 }
 0x105   :  { %v334_v47 = vpop.xlane.xlu1 %333  ;;  %v603_v4 = vrot.slane %v349_v5, %v1628_v14 }
 0x106   :  { %v398_v49 = vmul.f32 0.00390625, %v334_v47  ;;  %v283_v3 = vpop.xlane.xlu0 %282  ;;  %v691_v60 = vsel %vm611_vm14, %v690_v10, %v686_v58 }
 0x107   :  { %v381_v48 = vmul.f32 0.00390625, %v283_v3 }
 0x108   :  { %v848_v53 = vrot.slane %v398_v49, %v1631_v16 }
 0x109   :  { %v764_v57 = vrot.slane %v381_v48, %v1628_v14  ;;  %v286_v37 = vpop.xlane.xlu1 %285  ;;  %v598_v14 = vsel %vm597_vm12, %v596_v56, %v591_v6 }
 0x10a   :  { %v382_v38 = vmul.f32 0.00390625, %v286_v37  ;;  %v190_v39 = vpop.xlane.xlu0 %189  ;;  %v849_v61 = vsel %vm611_vm14, %v848_v53, %v844_v59  ;;  %v605_v12 = vsel %vm604_vm13, %v603_v4, %v598_v14 }
 0x10b   :  { %v350_v9 = vmul.f32 0.00390625, %v190_v39  ;;  %v852_v40 = vsel %vm850_vm15, %v849_v61, %v691_v60  ;;  %v765_v62 = vsel %vm604_vm13, %v764_v57, %v760_v7 }
 0x10c   :  { %v769_v8 = vrot.slane %v382_v38, %v1631_v16  ;;  %919 = vmatprep.mubr.f32.mxu0 %v852_v40 }
 0x10d   :  { %v610_v11 = vrot.slane %v350_v9, %v1631_v16 }
 0x10e   :  { %v770_v17 = vsel %vm611_vm14, %v769_v8, %v765_v62 }
 0x10f   :  { %v612_v42 = vsel %vm611_vm14, %v610_v11, %v605_v12 }
 0x110   :  { %v851_v18 = vsel %vm850_vm15, %v770_v17, %v612_v42 }
 0x111   :  { %920 = vmatmul.mubr.f32.vlgmr.msra.gmra.mxu0 %v851_v18 }
 0x1d1   :  { %v985_v19 = vpop.f32.mrf.mxu0 }
 0x1d3   :  { %v986_v21 = vpop.f32.mrf.mxu0 }
 0x1d4   :  { %v987_v52 = vadd.f32 %v986_v21, %v985_v19 }
 0x1d6   :  { %v922_v16 = vadd.f32 %v987_v52, %v952_v22 }
 0x1d8   :  { %v926_v23 = vsel %vm925_vm0, %v922_v16, -inf }
 0x1d9   :  { %927 = vmax.xlane.f32.xlu0 %v926_v23 }
 0x262   :  { %v928_v2 = vpop.xlane.xlu0 %927 }
 0x263   :  { %v929_v24 = vsub.f32 %v922_v16, %v928_v2 }
 0x265   :  { %v930_v41 = vmul.f32 1.442695, %v929_v24 }
 0x267   :  { %989 = vpow2.f32 %v930_v41 }
 0x274   :  { %v990_v63 = vpop.eup %989 }
 0x275   :  { %v932_v55 = vsel %vm925_vm0, %v990_v63, 0.0 }
 0x276   :  { %933 = vadd.xlane.f32.xlu1 %v932_v55 }
 0x2ff   :  { %v934_v30 = vpop.xlane.xlu1 %933 }
 0x300   :  { %991 = vrcp.f32 %v934_v30 }
 0x30d   :  { %v992_v44 = vpop.eup %991 }
 0x30e   :  { %v936_v45 = vmul.f32 %v992_v44, %v990_v63 }
 0x310   :  { %937 = vst.msk [vmem:[#allocation2] sm:$0x3] %vm925_vm0, %v936_v45 }
 0x311   :  { %1004 = shalt.err (!%p1001_p4)
}
 0x312   :  { %947 = dma.vmem_to_hbm [thread:$0]  %s945_s8, 32, %s1737_s3, [#allocation3]  }
 0x313   :  { %1013 = dma.done.wait [#allocation3], 32  }
 0x314   :  { %1014 = vsyncadd [#allocation3], 4294967264 }
 0x315   :  { %951 = vsyncpa [#allocation3], 1 }

</bundles_post_ra>
